<compile_context>
chip_gen: v5e
topology: v5e:2x2
jax: 0.10.0
libtpu: 0.0.40
codegen_flags: <defaults>
</compile_context>

<pallas_src>
import functools
import math

import jax
import jax.numpy as jnp
from jax.experimental import pallas as pl
from jax.experimental.pallas import tpu as pltpu


def _fourier_kernel(x_ref, w_ref, b_ref, o_ref, *, dim, group):
    # x_ref: (tile, group) f32
    # w_ref, b_ref: (1, group*dim) f32, already scaled by 2*pi and tiled per group
    # o_ref: (tile, group*dim)
    # out[r, g*dim + d] = cos(x[r, g] * (2*pi*weight[d]) + 2*pi*bias[d])
    x = x_ref[...]
    w = w_ref[...]
    b = b_ref[...]
    tile = x.shape[0]
    lanes = group * dim

    if group == 1:
        x_rep = jnp.broadcast_to(x, (tile, lanes))
    else:
        # Expand x so lane l holds x[:, l // dim].  Built from lane-broadcasts and
        # selects (VPU/XLU only) to keep the output lane-dense without reshapes.
        lane = jax.lax.broadcasted_iota(jnp.int32, (tile, lanes), 1)
        x_rep = jnp.broadcast_to(x[:, 0:1], (tile, lanes))
        for g in range(1, group):
            x_rep = jnp.where(
                lane >= g * dim,
                jnp.broadcast_to(x[:, g:g + 1], (tile, lanes)),
                x_rep,
            )

    o_ref[...] = jnp.cos(x_rep * w + b).astype(o_ref.dtype)


def _round_up(a, b):
    return -(-a // b) * b


@functools.partial(jax.jit, static_argnames=("row_tile", "out_dtype"))
def fourier_embeddings(x, weight, bias, *, row_tile=1024, out_dtype=jnp.float32):
    """cos(2*pi*(x[..., None] * weight + bias)) via a Pallas TPU kernel."""
    dim = weight.shape[0]
    orig_shape = x.shape
    xf = x.reshape(-1).astype(jnp.float32)
    n = xf.shape[0]

    # Lane packing: group consecutive x values per 128-lane output row when possible.
    if dim < 128 and 128 % dim == 0:
        group = 128 // dim
    else:
        group = 1
    lanes = group * dim

    rows = -(-n // group)                      # cdiv
    rows8 = _round_up(max(rows, 1), 8)         # sublane multiple
    tile = min(row_tile, rows8)                # small inputs -> single grid step
    tile = max(8, (tile // 8) * 8)
    rows_pad = _round_up(rows8, tile)
    n_pad = rows_pad * group

    if n_pad != n:
        xf = jnp.pad(xf, (0, n_pad - n))       # padded rows compute cos(2*pi*b); sliced off
    x2 = xf.reshape(rows_pad, group)

    two_pi = jnp.float32(2.0 * math.pi)
    w2 = jnp.tile(two_pi * weight.astype(jnp.float32), group).reshape(1, lanes)
    b2 = jnp.tile(two_pi * bias.astype(jnp.float32), group).reshape(1, lanes)

    grid = (rows_pad // tile,)
    out = pl.pallas_call(
        functools.partial(_fourier_kernel, dim=dim, group=group),
        out_shape=jax.ShapeDtypeStruct((rows_pad, lanes), out_dtype),
        grid_spec=pltpu.PrefetchScalarGridSpec(
            num_scalar_prefetch=0,
            grid=grid,
            in_specs=[
                pl.BlockSpec((tile, group), lambda i: (i, 0)),   # x rows (tiny DMA)
                pl.BlockSpec((1, lanes), lambda i: (0, 0)),      # 2*pi*weight (resident)
                pl.BlockSpec((1, lanes), lambda i: (0, 0)),      # 2*pi*bias   (resident)
            ],
            out_specs=pl.BlockSpec((tile, lanes), lambda i: (i, 0)),
        ),
        compiler_params=pltpu.CompilerParams(
            dimension_semantics=("parallel",),
        ),
    )(x2, w2, b2)

    out = out.reshape(rows_pad * group, dim)
    if n_pad != n:
        out = out[:n]
    return out.reshape(*orig_shape, dim)


def _reference(x, weight, bias):
    return jnp.cos(2.0 * jnp.pi * (x[..., None].astype(jnp.float32)
                                   * weight.astype(jnp.float32)
                                   + bias.astype(jnp.float32)))


if __name__ == "__main__":
    key = jax.random.PRNGKey(0)
    k_x, k_w, k_b, k_x2, k_w2, k_b2, k_x3 = jax.random.split(key, 7)

    # Case 1: dim=32 (lane-packed path, group=4), small batch -> single grid step.
    dim = 32
    x = jax.random.normal(k_x, (2, 8), dtype=jnp.float32)
    weight = jax.random.normal(k_w, (dim,), dtype=jnp.float32)
    bias = jax.random.uniform(k_b, (dim,), dtype=jnp.float32)
    out = jax.block_until_ready(fourier_embeddings(x, weight, bias))
    ref = _reference(x, weight, bias)
    assert out.shape == (2, 8, dim), out.shape
    assert jnp.allclose(out, ref, atol=1e-4, rtol=1e-4), float(jnp.max(jnp.abs(out - ref)))

    # Case 2: dim=256 (already lane-dense, group=1), 3-D batch.
    dim2 = 256
    x2 = jax.random.normal(k_x2, (4, 16, 3), dtype=jnp.float32)
    w2 = jax.random.normal(k_w2, (dim2,), dtype=jnp.float32)
    b2 = jax.random.uniform(k_b2, (dim2,), dtype=jnp.float32)
    out2 = jax.block_until_ready(fourier_embeddings(x2, w2, b2))
    ref2 = _reference(x2, w2, b2)
    assert out2.shape == (4, 16, 3, dim2), out2.shape
    assert jnp.allclose(out2, ref2, atol=1e-4, rtol=1e-4), float(jnp.max(jnp.abs(out2 - ref2)))

    # Case 3: force a multi-step grid with a ragged (padded) tail.
    x3 = jax.random.normal(k_x3, (2, 300), dtype=jnp.float32)
    out3 = jax.block_until_ready(fourier_embeddings(x3, weight, bias, row_tile=64))
    ref3 = _reference(x3, weight, bias)
    assert out3.shape == (2, 300, dim), out3.shape
    assert jnp.allclose(out3, ref3, atol=1e-4, rtol=1e-4), float(jnp.max(jnp.abs(out3 - ref3)))

    print("KERNEL_OK")
</pallas_src>

<mosaic_0001>
module attributes {stable_mosaic.version = 11 : i64} {
  func.func @_fourier_kernel(%arg0: i32, %arg1: memref<8x4xf32, #tpu.memory_space<vmem>>, %arg2: memref<1x128xf32, #tpu.memory_space<vmem>>, %arg3: memref<1x128xf32, #tpu.memory_space<vmem>>, %arg4: memref<8x128xf32, #tpu.memory_space<vmem>>) attributes {dimension_semantics = [#tpu.dimension_semantics<parallel>], iteration_bounds = array<i64: 1>, scalar_prefetch = 0 : i64, scratch_operands = 0 : i64, tpu.core_type = #tpu.core_type<tc>, window_params = [{transform_indices = @transform_0, window_bounds = array<i64: 8, 4>}, {pipeline_mode = #tpu.pipeline_mode<synchronous>, transform_indices = @transform_1, window_bounds = array<i64: 1, 128>}, {pipeline_mode = #tpu.pipeline_mode<synchronous>, transform_indices = @transform_2, window_bounds = array<i64: 1, 128>}, {transform_indices = @transform_3, window_bounds = array<i64: 8, 128>}]} {
    %c0 = arith.constant 0 : index
    %c0_0 = arith.constant 0 : index
    %0 = vector.load %arg1[%c0, %c0_0] : memref<8x4xf32, #tpu.memory_space<vmem>>, vector<8x4xf32>
    %c0_1 = arith.constant 0 : index
    %c0_2 = arith.constant 0 : index
    %1 = vector.load %arg2[%c0_1, %c0_2] : memref<1x128xf32, #tpu.memory_space<vmem>>, vector<1x128xf32>
    %c0_3 = arith.constant 0 : index
    %c0_4 = arith.constant 0 : index
    %2 = vector.load %arg3[%c0_3, %c0_4] : memref<1x128xf32, #tpu.memory_space<vmem>>, vector<1x128xf32>
    %3 = tpu.iota {dimensions = array<i32: 1>} : vector<8x128xi32>
    %4 = vector.extract_strided_slice %0 {offsets = [0, 0], sizes = [8, 1], strides = [1, 1]} : vector<8x4xf32> to vector<8x1xf32>
    %5 = vector.shape_cast %4 : vector<8x1xf32> to vector<8x1xf32>
    %6 = vector.broadcast %5 : vector<8x1xf32> to vector<8x128xf32>
    %c32_i32 = arith.constant 32 : i32
    %7 = vector.broadcast %c32_i32 : i32 to vector<8x128xi32>
    %8 = arith.cmpi sge, %3, %7 : vector<8x128xi32>
    %9 = vector.extract_strided_slice %0 {offsets = [0, 1], sizes = [8, 1], strides = [1, 1]} : vector<8x4xf32> to vector<8x1xf32>
    %10 = vector.shape_cast %9 : vector<8x1xf32> to vector<8x1xf32>
    %11 = vector.broadcast %10 : vector<8x1xf32> to vector<8x128xf32>
    %12 = arith.select %8, %11, %6 : vector<8x128xi1>, vector<8x128xf32>
    %c64_i32 = arith.constant 64 : i32
    %13 = vector.broadcast %c64_i32 : i32 to vector<8x128xi32>
    %14 = arith.cmpi sge, %3, %13 : vector<8x128xi32>
    %15 = vector.extract_strided_slice %0 {offsets = [0, 2], sizes = [8, 1], strides = [1, 1]} : vector<8x4xf32> to vector<8x1xf32>
    %16 = vector.shape_cast %15 : vector<8x1xf32> to vector<8x1xf32>
    %17 = vector.broadcast %16 : vector<8x1xf32> to vector<8x128xf32>
    %18 = arith.select %14, %17, %12 : vector<8x128xi1>, vector<8x128xf32>
    %c96_i32 = arith.constant 96 : i32
    %19 = vector.broadcast %c96_i32 : i32 to vector<8x128xi32>
    %20 = arith.cmpi sge, %3, %19 : vector<8x128xi32>
    %21 = vector.extract_strided_slice %0 {offsets = [0, 3], sizes = [8, 1], strides = [1, 1]} : vector<8x4xf32> to vector<8x1xf32>
    %22 = vector.shape_cast %21 : vector<8x1xf32> to vector<8x1xf32>
    %23 = vector.broadcast %22 : vector<8x1xf32> to vector<8x128xf32>
    %24 = arith.select %20, %23, %18 : vector<8x128xi1>, vector<8x128xf32>
    %25 = vector.broadcast %1 : vector<1x128xf32> to vector<8x128xf32>
    %26 = arith.mulf %24, %25 : vector<8x128xf32>
    %27 = vector.broadcast %2 : vector<1x128xf32> to vector<8x128xf32>
    %28 = arith.addf %26, %27 : vector<8x128xf32>
    %29 = math.cos %28 : vector<8x128xf32>
    %c0_5 = arith.constant 0 : index
    %c0_6 = arith.constant 0 : index
    %30 = vector.load %arg4[%c0_5, %c0_6] : memref<8x128xf32, #tpu.memory_space<vmem>>, vector<8x128xf32>
    tpu.vector_store %arg4[%c0_5, %c0_6], %29 {strides = array<i32>} : memref<8x128xf32, #tpu.memory_space<vmem>>, vector<8x128xf32>,
    return
  }
  func.func @transform_0(%arg0: i32) -> (i32, i32) {
    %c0_i32 = arith.constant 0 : i32
    %c0_i32_0 = arith.constant 0 : i32
    return %arg0, %c0_i32 : i32, i32
  }
  func.func @transform_1(%arg0: i32) -> (i32, i32) {
    %c0_i32 = arith.constant 0 : i32
    %c0_i32_0 = arith.constant 0 : i32
    %c0_i32_1 = arith.constant 0 : i32
    return %c0_i32, %c0_i32_0 : i32, i32
  }
  func.func @transform_2(%arg0: i32) -> (i32, i32) {
    %c0_i32 = arith.constant 0 : i32
    %c0_i32_0 = arith.constant 0 : i32
    %c0_i32_1 = arith.constant 0 : i32
    return %c0_i32, %c0_i32_0 : i32, i32
  }
  func.func @transform_3(%arg0: i32) -> (i32, i32) {
    %c0_i32 = arith.constant 0 : i32
    %c0_i32_0 = arith.constant 0 : i32
    return %arg0, %c0_i32 : i32, i32
  }
}

</mosaic_0001>

<bundles_post_ra>
// kernel: tile.18
= control target key start
LH: loop header
LB: loop body
LE: loop exit
PB: predicated region body
PF: predicated region fallthrough
CT: control target
= control target key end

     0   :  { %s22_s0 = inlined_call_operand.vmem [shape: f32[32], index: 0, kind: input, shape index: {}]   ;;  %s23_s1 = inlined_call_operand.vmem [shape: f32[4,32], index: 1, kind: output, shape index: {}]  }
   0x1   :  { %v4_v0 = vld [vmem:[%s22_s0] ss:$0 sm:$0xff] }
   0x2   :  { %5 = vst [vmem:[%s23_s1] sm:$0xf] %v4_v0 }

// kernel: tile.19
= control target key start
LH: loop header
LB: loop body
LE: loop exit
PB: predicated region body
PF: predicated region fallthrough
CT: control target
= control target key end

     0   :  { %s37_s8 = smov 32   ;;  %s38_s9 = smov 64   ;;  %vm7_vm0 = vcmask 261120   ;;  %vm13_vm1 = vcmask 1048320   ;;  %vm19_vm2 = vcmask 785920   ;;  %vm25_vm3 = vcmask 523520   ;;  %s55_s0 = inlined_call_operand.vmem [shape: f32[4,32], index: 0, kind: input, shape index: {}]   ;;  %s56_s1 = inlined_call_operand.vmem [shape: f32[1,128], index: 1, kind: output, shape index: {}]  }
   0x1   :  { %v4_v0 = vld [vmem:[%s55_s0] sm:$0xf]  ;;  %s36_s0 = smov 96  }
   0x2   :  { %5 = vst [vmem:[#allocation1] sm:$0xf] %v4_v0 }
   0x9   :  { %v10_v1 = vld [vmem:[#allocation1 + $0x3] sm:$0x1]   ;;  %v22_v2 = vld [vmem:[#allocation1 + $0x1] sm:$0x1]   ;;  %v16_v3 = vld [vmem:[#allocation1 + $0x2] sm:$0x1]  }
   0xa   :  { %11 = vrot.lane.b32.xlu0 %v10_v1, %s36_s0  ;;  %23 = vrot.lane.b32.xlu1 %v22_v2, %s37_s8  ;;  %v6_v4 = vld [vmem:[#allocation1] sm:$0x1]  }
   0xb   :  { %8 = vst.msk [vmem:[#allocation0] sm:$0x1] %vm7_vm0, %v6_v4  }
  0x12   :  { %17 = vrot.lane.b32.xlu0 %v16_v3, %s38_s9 }
  0x7c   :  { %v12_v5 = vpop.permute.xlu0 %11   ;;  %v24_v6 = vpop.permute.xlu1 %23  }
  0x7d   :  { %14 = vst.msk [vmem:[#allocation0] sm:$0x1] %vm13_vm1, %v12_v5  }
  0x84   :  { %v18_v7 = vpop.permute.xlu0 %17  }
  0x85   :  { %20 = vst.msk [vmem:[#allocation0] sm:$0x1] %vm19_vm2, %v18_v7  }
  0x86   :  { %26 = vst.msk [vmem:[#allocation0] sm:$0x1] %vm25_vm3, %v24_v6  }
  0x8d   :  { %v29_v8 = vld [vmem:[#allocation0] sm:$0x1] }
  0x8e   :  { %32 = vst [vmem:[%s56_s1] sm:$0x1] %v29_v8 }

// kernel: fourier_embeddings.1
= control target key start
LH: loop header
LB: loop body
LE: loop exit
PB: predicated region body
PF: predicated region fallthrough
CT: control target
= control target key end

     0   :  { %v229_v0 = vmov 0   ;;  %v230_v2 = vmov 2   ;;  %v231_v3 = vmov 1   ;;  %v232_v4 = vmov 3   ;;  %s340_s0 = inlined_call_operand.vmem [shape: f32[8,4], index: 0, kind: input, shape index: {}]   ;;  %s341_s1 = inlined_call_operand.vmem [shape: f32[1,128], index: 1, kind: input, shape index: {}]   ;;  %s342_s2 = inlined_call_operand.vmem [shape: f32[1,128], index: 2, kind: input, shape index: {}]   ;;  %s343_s3 = inlined_call_operand.vmem [shape: f32[8,128], index: 3, kind: output, shape index: {}]  }
   0x1   :  { %222 = vset.pattern.permute.xlu0 %v229_v0  ;;  %v14_v1 = vld [vmem:[%s340_s0] sm:$0xff]  ;;  %224 = vset.pattern.permute.xlu1 %v230_v2  ;;  %v17_v5 = vlaneseq  ;;  %v233_v29 = vmov 683565275   ;;  %v234_v31 = vmov 2475754826  }
   0x2   :  { %21 = vperm.xlu0 %222, %v14_v1   ;;  %32 = vperm.xlu1 %224, %v14_v1   ;;  %v227_v10 = vld [vmem:[%s341_s1] ss:$0 sm:$0xff]  ;;  %v235_v34 = vmov 2131351028   ;;  %v236_v37 = vmov 2102212464  }
   0x3   :  { %v18_v8 = vand.u32 127, %v17_v5  ;;  %v228_v13 = vld [vmem:[%s342_s2] ss:$0 sm:$0xff]  ;;  %v237_v40 = vmov 920167782  }
   0x4   :  { %v238_v43 = vmov 1326507024  }
   0x5   :  { %vm24_vm0 = vcmp.ge.s32.totalorder %v18_v8, 32  ;;  %vm30_vm1 = vcmp.ge.s32.totalorder %v18_v8, 64  ;;  %vm36_vm2 = vcmp.ge.s32.totalorder %v18_v8, 96 }
   0xa   :  { %223 = vset.pattern.permute.xlu0 %v231_v3  ;;  %225 = vset.pattern.permute.xlu1 %v232_v4 }
   0xb   :  { %26 = vperm.xlu0 %223, %v14_v1   ;;  %38 = vperm.xlu1 %225, %v14_v1  }
  0x13   :  { %226 = vset.pattern.permute.xlu0 %v232_v4 }
  0x74   :  { %v22_v6 = vpop.permute.xlu0 %21  ;;  %v33_v7 = vpop.permute.xlu1 %32 }
  0x7d   :  { %v27_v9 = vpop.permute.xlu0 %26  ;;  %v39_v11 = vpop.permute.xlu1 %38 }
  0x7e   :  { %v29_v12 = vsel %vm24_vm0, %v27_v9, %v22_v6 }
  0x7f   :  { %v35_v14 = vsel %vm30_vm1, %v33_v7, %v29_v12 }
  0x80   :  { %v41_v15 = vsel %vm36_vm2, %v39_v11, %v35_v14 }
  0x81   :  { %v45_v16 = vmul.f32 %v227_v10, %v41_v15 }
  0x83   :  { %v269_v17 = vadd.f32 %v228_v13, %v45_v16 }
  0x85   :  { %v53_v18 = vand.u32 2139095040, %v269_v17  ;;  %v50_v21 = vand.u32 2147483647, %v269_v17  ;;  %vm52_vm15 = vcmp.lt.s32.totalorder %v269_v17, 0 }
  0x87   :  { %v54_v19 = vshrl.u32 %v53_v18, 23  ;;  %v57_v23 = vand.u32 8388607, %v50_v21  ;;  %vm327_vm0 = vcmp.le.f32.partialorder %v50_v21, 0.7853982 }
  0x89   :  { %v209_v20 = vadd.s32 4294967169, %v54_v19  ;;  %v58_v27 = vor.u32 8388608, %v57_v23 }
  0x8b   :  { %v60_v22 = vadd.s32 1, %v209_v20  ;;  %v286_v50 = vshll.u32 %v58_v27, 8 }
  0x8d   :  { %vm61_vm3 = vcmp.gt.s32.totalorder %v60_v22, 0  ;;  %v99_v59 = vand.u32 65535, %v286_v50  ;;  %v100_v60 = vshrl.u32 %v286_v50, 16 }
  0x8e   :  { %v62_v24 = vsel %vm61_vm3, %v60_v22, 0 }
  0x8f   :  { %v64_v25 = vand.u32 31, %v62_v24  ;;  %v277_v28 = vshrl.u32 %v62_v24, 5 }
  0x91   :  { %v275_v26 = vsub.s32 32, %v64_v25  ;;  %v67_v30 = vshll.u32 %v233_v29, %v64_v25  ;;  %v70_v32 = vshll.u32 %v234_v31, %v64_v25  ;;  %v73_v36 = vshll.u32 %v235_v34, %v64_v25 }
  0x92   :  { %v76_v39 = vshll.u32 %v236_v37, %v64_v25  ;;  %v79_v42 = vshll.u32 %v237_v40, %v64_v25  ;;  %vm82_vm4 = vcmp.lt.s32.totalorder %v277_v28, 1  ;;  %vm85_vm5 = vcmp.lt.s32.totalorder %v277_v28, 4 }
  0x93   :  { %v68_v33 = vshrl.u32 %v234_v31, %v275_v26  ;;  %v71_v35 = vshrl.u32 %v235_v34, %v275_v26  ;;  %v74_v38 = vshrl.u32 %v236_v37, %v275_v26  ;;  %v77_v41 = vshrl.u32 %v237_v40, %v275_v26 }
  0x94   :  { %v80_v44 = vshrl.u32 %v238_v43, %v275_v26  ;;  %vm84_vm6 = vcmp.lt.s32.totalorder %v277_v28, 3  ;;  %vm83_vm7 = vcmp.lt.s32.totalorder %v277_v28, 2  ;;  %v66_v24 = vshrl.u32 %v233_v29, %v275_v26 }
  0x95   :  { %v69_v45 = vor.u32 %v68_v33, %v67_v30  ;;  %v72_v46 = vor.u32 %v71_v35, %v70_v32  ;;  %v75_v47 = vor.u32 %v74_v38, %v73_v36  ;;  %v78_v48 = vor.u32 %v77_v41, %v76_v39 }
  0x96   :  { %v81_v49 = vor.u32 %v80_v44, %v79_v42 }
  0x97   :  { %v90_v51 = vsel %vm82_vm4, %v69_v45, %v72_v46  ;;  %v94_v52 = vsel %vm82_vm4, %v72_v46, %v75_v47  ;;  %v91_v53 = vsel %vm85_vm5, %v78_v48, 920167782  ;;  %v87_v20 = vsel %vm85_vm5, %v75_v47, 2102212464 }
  0x98   :  { %v95_v54 = vsel %vm85_vm5, %v81_v49, 1326507024  ;;  %v92_v55 = vsel %vm84_vm6, %v75_v47, %v91_v53  ;;  %v86_v33 = vsel %vm82_vm4, %v66_v24, %v69_v45  ;;  %v88_v34 = vsel %vm84_vm6, %v72_v46, %v87_v20 }
  0x99   :  { %v96_v56 = vsel %vm84_vm6, %v78_v48, %v95_v54  ;;  %v93_v57 = vsel %vm83_vm7, %v90_v51, %v92_v55  ;;  %v89_v26 = vsel %vm83_vm7, %v86_v33, %v88_v34  ;;  %vm193_vm4 = vweird.f32 %v269_v17 }
  0x9a   :  { %v97_v58 = vsel %vm83_vm7, %v94_v52, %v96_v56  ;;  %v123_v63 = vand.u32 65535, %v93_v57  ;;  %v124_v1 = vshrl.u32 %v93_v57, 16  ;;  %v143_v41 = vmul.u32 %v286_v50, %v89_v26 }
  0x9b   :  { %v101_v61 = vand.u32 65535, %v97_v58  ;;  %v102_v62 = vshrl.u32 %v97_v58, 16 }
  0x9c   :  { %v126_v4 = vmul.u32 %v124_v1, %v99_v59  ;;  %v127_v5 = vmul.u32 %v123_v63, %v100_v60  ;;  %v125_v9 = vmul.u32 %v123_v63, %v99_v59  ;;  %v128_v13 = vmul.u32 %v124_v1, %v100_v60 }
  0x9d   :  { %v104_v2 = vmul.u32 %v102_v62, %v99_v59  ;;  %v105_v3 = vmul.u32 %v101_v61, %v100_v60  ;;  %v103_v6 = vmul.u32 %v101_v61, %v99_v59  ;;  %v106_v8 = vmul.u32 %v102_v62, %v100_v60 }
  0x9e   :  { %v129_v10 = vshll.u32 %v126_v4, 16  ;;  %v131_v15 = vshll.u32 %v127_v5, 16  ;;  %v130_v31 = vshrl.u32 %v126_v4, 16  ;;  %v132_v37 = vshrl.u32 %v127_v5, 16 }
  0x9f   :  { %v107_v7 = vshll.u32 %v104_v2, 16  ;;  %v109_v11 = vshll.u32 %v105_v3, 16  ;;  %v108_v25 = vshrl.u32 %v104_v2, 16  ;;  %v110_v35 = vshrl.u32 %v105_v3, 16 }
  0xa0   :  { %vm133_vm9 = vc.u32 %v125_v9, %v129_v10  ;;  %v135_v16 = vadd.s32 %v129_v10, %v125_v9 }
  0xa1   :  { %vm111_vm8 = vc.u32 %v103_v6, %v107_v7  ;;  %v113_v12 = vadd.s32 %v107_v7, %v103_v6  ;;  %v134_v19 = vsel %vm133_vm9, 1, %v229_v0 }
  0xa2   :  { %v112_v14 = vsel %vm111_vm8, 1, %v229_v0  ;;  %v136_v23 = vadd.s32 %v134_v19, %v128_v13  ;;  %vm137_vm11 = vc.u32 %v135_v16, %v131_v15  ;;  %v139_v40 = vadd.s32 %v135_v16, %v131_v15 }
  0xa3   :  { %v114_v18 = vadd.s32 %v112_v14, %v106_v8  ;;  %vm115_vm10 = vc.u32 %v113_v12, %v109_v11  ;;  %v138_v30 = vsel %vm137_vm11, 1, %v229_v0 }
  0xa4   :  { %v116_v22 = vsel %vm115_vm10, 1, %v229_v0  ;;  %v140_v32 = vadd.s32 %v138_v30, %v136_v23 }
  0xa5   :  { %v118_v27 = vadd.s32 %v116_v22, %v114_v18 }
  0xa6   :  { %v141_v38 = vadd.s32 %v140_v32, %v130_v31 }
  0xa7   :  { %v119_v36 = vadd.s32 %v118_v27, %v108_v25 }
  0xa8   :  { %v142_v29 = vadd.s32 %v141_v38, %v132_v37 }
  0xa9   :  { %v120_v39 = vadd.s32 %v119_v36, %v110_v35 }
  0xaa   :  { %v146_v0 = vadd.s32 1, %v142_v29 }
  0xab   :  { %vm145_vm12 = vc.u32 %v120_v39, %v139_v40  ;;  %v144_v28 = vadd.s32 %v139_v40, %v120_v39 }
  0xac   :  { %v147_v42 = vsel %vm145_vm12, %v146_v0, %v142_v29 }
  0xad   :  { %v148_v43 = vadd.s32 %v147_v42, %v143_v41 }
  0xaf   :  { %v149_v44 = vadd.s32 536870912, %v148_v43 }
  0xb1   :  { %v150_v45 = vshrl.u32 %v149_v44, 30 }
  0xb3   :  { %v151_v47 = vshll.u32 %v150_v45, 30  ;;  %v174_v8 = vsub.s32 4, %v150_v45 }
  0xb5   :  { %v152_v46 = vsub.s32 %v148_v43, %v151_v47  ;;  %v175_v13 = vsel %vm52_vm15, %v174_v8, %v150_v45 }
  0xb6   :  { %v177_v21 = vsel %vm327_vm0, 0, %v175_v13 }
  0xb7   :  { %vm153_vm13 = vcmp.lt.s32.totalorder %v152_v46, 0  ;;  %v154_v48 = vsub.s32 0, %v152_v46  ;;  %v194_v22 = vand.u32 3, %v177_v21 }
  0xb9   :  { %v155_v49 = vsel %vm153_vm13, %v154_v48, %v152_v46  ;;  %vm196_vm1 = vcmp.eq.s32.totalorder %v194_v22, 0  ;;  %vm199_vm2 = vcmp.eq.s32.totalorder %v194_v22, 2  ;;  %vm195_vm3 = vcmp.lt.s32.totalorder %v194_v22, 2 }
  0xba   :  { %v156_v51 = vclz %v155_v49 }
  0xbc   :  { %v210_v52 = vadd.s32 4294967294, %v156_v51 }
  0xbe   :  { %vm211_vm14 = vcmp.lt.s32.totalorder %v210_v52, 0 }
  0xbf   :  { %v159_v53 = vsel %vm211_vm14, 0, %v210_v52 }
  0xc0   :  { %v160_v54 = vsub.s32 32, %v159_v53  ;;  %v164_v55 = vsub.s32 4294967266, %v159_v53  ;;  %v161_v56 = vshll.u32 %v152_v46, %v159_v53 }
  0xc2   :  { %v162_v57 = vshrl.u32 %v144_v28, %v160_v54  ;;  %v165_v58 = vadd.s32 127, %v164_v55 }
  0xc4   :  { %v163_v50 = vor.u32 %v162_v57, %v161_v56  ;;  %v166_v59 = vshll.u32 %v165_v58, 23 }
  0xc6   :  { %v167_v60 = vor.u32 4788187, %v166_v59  ;;  %v170_v62 = vcvt.s32.f32 %v163_v50 }
  0xc8   :  { %v168_v61 = vand.u32 2147483647, %v167_v60 }
  0xca   :  { %v171_v63 = vmul.f32 %v170_v62, %v168_v61 }
  0xcc   :  { %v172_v1 = vxor.u32 2147483648, %v171_v63 }
  0xce   :  { %v173_v3 = vsel %vm52_vm15, %v172_v1, %v171_v63 }
  0xcf   :  { %v176_v4 = vsel %vm327_vm0, %v269_v17, %v173_v3 }
  0xd0   :  { %v178_v5 = vmul.f32 %v176_v4, %v176_v4 }
  0xd2   :  { %v179_v6 = vmul.f32 -0.001358992, %v178_v5  ;;  %v186_v7 = vmul.f32 -0.00019511016, %v178_v5 }
  0xd4   :  { %v180_v9 = vadd.f32 0.041655596, %v179_v6  ;;  %v187_v10 = vadd.f32 0.008332121, %v186_v7 }
  0xd6   :  { %v181_v11 = vmul.f32 %v180_v9, %v178_v5  ;;  %v188_v12 = vmul.f32 %v187_v10, %v178_v5 }
  0xd8   :  { %v182_v14 = vadd.f32 -0.4999988, %v181_v11  ;;  %v189_v15 = vadd.f32 -0.16666654, %v188_v12 }
  0xda   :  { %v183_v16 = vmul.f32 %v182_v14, %v178_v5  ;;  %v190_v18 = vmul.f32 %v189_v15, %v178_v5 }
  0xdc   :  { %v184_v19 = vadd.f32 1.0, %v183_v16  ;;  %v191_v20 = vadd.f32 1.0, %v190_v18 }
  0xde   :  { %v192_v23 = vmul.f32 %v191_v20, %v176_v4  ;;  %v200_v24 = vxor.u32 2147483648, %v184_v19 }
  0xe0   :  { %v197_v25 = vxor.u32 2147483648, %v192_v23  ;;  %v201_v30 = vsel %vm199_vm2, %v200_v24, %v192_v23 }
  0xe2   :  { %v198_v27 = vsel %vm196_vm1, %v184_v19, %v197_v25 }
  0xe3   :  { %v202_v31 = vsel %vm195_vm3, %v198_v27, %v201_v30 }
  0xe4   :  { %v203_v32 = vsel %vm193_vm4, nan, %v202_v31 }
  0xe5   :  { %204 = vst [vmem:[%s343_s3] sm:$0xff] %v203_v32 }

</bundles_post_ra>
